<compile_context>
chip_gen: v6e
topology: v6e:2x2x1
jax: 0.10.0
libtpu: 0.0.40
codegen_flags: <defaults>
</compile_context>

<pallas_src>
import math
import jax
import jax.numpy as jnp
from jax.experimental import pallas as pl
from jax.experimental.pallas import tpu as pltpu


def _ffn_kernel(x_ref, w1_ref, b1_ref, w2_ref, b2_ref, o_ref, acc_ref):
    # x_ref : (tm, D)   row tile of flattened tokens   (native dtype)
    # w1_ref: (D, th)   H-chunk of first weight        (native dtype)
    # b1_ref: (1, th)
    # w2_ref: (th, D)   H-chunk of second weight       (native dtype)
    # b2_ref: (1, D)
    # acc_ref: (tm, D)  f32 accumulator scratch
    h_idx = pl.program_id(1)

    @pl.when(h_idx == 0)
    def _():
        acc_ref[...] = jnp.zeros_like(acc_ref)

    # Linear 1 (this H-chunk): native-dtype operands on the MXU, f32 accumulation.
    h = jnp.dot(x_ref[...], w1_ref[...], preferred_element_type=jnp.float32)
    h = h + b1_ref[...].astype(jnp.float32)

    # Exact GELU (erf formulation; matches torch.nn.GELU() default) in f32.
    h = 0.5 * h * (1.0 + jax.lax.erf(h * (1.0 / math.sqrt(2.0))))

    # Dropout (p) -> identity at inference.

    # Linear 2 partial sum: cast activation to the weight dtype (no-op for f32,
    # bf16 MXU path for bf16 weights), accumulate in f32.
    acc_ref[...] += jnp.dot(h.astype(w2_ref.dtype), w2_ref[...],
                            preferred_element_type=jnp.float32)

    @pl.when(h_idx == pl.num_programs(1) - 1)
    def _():
        o_ref[...] = (acc_ref[...] + b2_ref[...].astype(jnp.float32)).astype(o_ref.dtype)


def _round_up(x, m):
    return ((x + m - 1) // m) * m


def _vmem_budget_bytes():
    """Generation-aware VMEM limit (~80% of physical), conservative fallback."""
    try:
        cap = pltpu.get_tpu_info().vmem_capacity_bytes
    except Exception:
        cap = 64 * 1024 * 1024  # safe on every generation (v7x has 64 MiB/TC)
    return int(cap * 0.8)


def _select_th(H, th_max=1024):
    """Largest 128-multiple hidden chunk that divides H (else full H, untiled)."""
    for th in (1024, 896, 768, 640, 512, 384, 256, 128):
        if th <= th_max and H % th == 0:
            return th
    return H


def _vmem_estimate(tm, th, D, x_bytes, w_bytes, o_bytes):
    # Double-buffered pipeline blocks + the f32 accumulator scratch.
    return (2 * tm * D * x_bytes          # x tile
            + 2 * D * th * w_bytes        # W1 chunk
            + 2 * th * D * w_bytes        # W2 chunk
            + 2 * th * w_bytes            # b1 chunk
            + 2 * D * w_bytes             # b2
            + 2 * tm * D * o_bytes        # out tile
            + tm * D * 4)                 # accumulator (f32)


def _select_tm(M, th, D, x_bytes, w_bytes, o_bytes, budget, tm_max=512):
    """Pick the row tile: fits VMEM; prefer >=2 row tiles (v7x megacore), then
    fewest row tiles (weights re-streamed once per row tile), then least pad."""
    m_min = _round_up(max(M, 1), 8)
    best = None
    for t in range(tm_max, 0, -8):
        if _vmem_estimate(t, th, D, x_bytes, w_bytes, o_bytes) > budget:
            continue
        m_pad = _round_up(m_min, t)
        steps = m_pad // t
        waste = m_pad - M
        key = (0 if steps >= 2 else 1, steps, waste, -t)
        if best is None or key < best[0]:
            best = (key, t, m_pad)
    if best is None:                      # pathological budget: smallest legal tile
        t = 8
        return t, _round_up(m_min, t)
    return best[1], best[2]


def feed_forward(x, w1, b1, w2, b2, *, tm_max=512, th_max=1024):
    """x: [B, S, D]; w1: [D, H]; b1: [H]; w2: [H, D]; b2: [D] -> [B, S, D]."""
    B, S, D = x.shape
    H = w1.shape[1]
    M = B * S

    budget = _vmem_budget_bytes()
    th = _select_th(H, th_max)
    tm, m_pad = _select_tm(M, th, D,
                           x.dtype.itemsize, w1.dtype.itemsize, x.dtype.itemsize,
                           budget, tm_max)

    x2d = x.reshape(M, D)
    if m_pad != M:
        x2d = jnp.pad(x2d, ((0, m_pad - M), (0, 0)))

    b1_2d = b1.reshape(1, H)
    b2_2d = b2.reshape(1, D)

    grid = (m_pad // tm, H // th)

    out2d = pl.pallas_call(
        _ffn_kernel,
        out_shape=jax.ShapeDtypeStruct((m_pad, D), x.dtype),
        grid_spec=pltpu.PrefetchScalarGridSpec(
            num_scalar_prefetch=0,
            grid=grid,
            in_specs=[
                pl.BlockSpec((tm, D), lambda i, h: (i, 0)),   # x row tile (const over h)
                pl.BlockSpec((D, th), lambda i, h: (0, h)),   # W1 H-chunk
                pl.BlockSpec((1, th), lambda i, h: (0, h)),   # b1 H-chunk
                pl.BlockSpec((th, D), lambda i, h: (h, 0)),   # W2 H-chunk
                pl.BlockSpec((1, D), lambda i, h: (0, 0)),    # b2 (grid-invariant)
            ],
            out_specs=pl.BlockSpec((tm, D), lambda i, h: (i, 0)),
            scratch_shapes=[pltpu.VMEM((tm, D), jnp.float32)],
        ),
        compiler_params=pltpu.CompilerParams(
            dimension_semantics=("parallel", "arbitrary"),
            vmem_limit_bytes=budget,
        ),
    )(x2d, w1, b1_2d, w2, b2_2d)

    if m_pad != M:
        out2d = out2d[:M]
    return out2d.reshape(B, S, D)


def _reference(x, w1, b1, w2, b2):
    h = jnp.dot(x, w1) + b1
    h = jax.nn.gelu(h, approximate=False)
    return jnp.dot(h, w2) + b2


if __name__ == "__main__":
    # Small shapes consistent with the module, lane-dense:
    # batch=2, seq=8, dim=128, hidden=4*dim=512.
    B, S, D = 2, 8, 128
    H = 4 * D

    key = jax.random.PRNGKey(0)
    kx, k1, k2, k3, k4 = jax.random.split(key, 5)

    x = jax.random.normal(kx, (B, S, D), dtype=jnp.float32)
    # Deterministic parameter init (Kaiming-uniform-ish scale, like nn.Linear defaults)
    w1 = jax.random.uniform(k1, (D, H), jnp.float32, -1.0, 1.0) / math.sqrt(D)
    b1 = jax.random.uniform(k2, (H,), jnp.float32, -1.0, 1.0) / math.sqrt(D)
    w2 = jax.random.uniform(k3, (H, D), jnp.float32, -1.0, 1.0) / math.sqrt(H)
    b2 = jax.random.uniform(k4, (D,), jnp.float32, -1.0, 1.0) / math.sqrt(H)

    y = feed_forward(x, w1, b1, w2, b2)
    y = jax.block_until_ready(y)

    y_ref = _reference(x, w1, b1, w2, b2)
    assert y.shape == (B, S, D)
    assert jnp.allclose(y, y_ref, atol=5e-4, rtol=5e-4), "mismatch vs reference"

    print("KERNEL_OK")
</pallas_src>

<mosaic_0001>
module attributes {stable_mosaic.version = 11 : i64} {
  func.func @_ffn_kernel(%arg0: i32, %arg1: i32, %arg2: memref<8x128xf32, #tpu.memory_space<vmem>>, %arg3: memref<128x512xf32, #tpu.memory_space<vmem>>, %arg4: memref<1x512xf32, #tpu.memory_space<vmem>>, %arg5: memref<512x128xf32, #tpu.memory_space<vmem>>, %arg6: memref<1x128xf32, #tpu.memory_space<vmem>>, %arg7: memref<8x128xf32, #tpu.memory_space<vmem>>, %arg8: memref<8x128xf32, #tpu.memory_space<vmem>>) attributes {dimension_semantics = [#tpu.dimension_semantics<parallel>, #tpu.dimension_semantics<arbitrary>], iteration_bounds = array<i64: 2, 1>, scalar_prefetch = 0 : i64, scratch_operands = 1 : i64, tpu.core_type = #tpu.core_type<tc>, window_params = [{transform_indices = @transform_0, window_bounds = array<i64: 8, 128>}, {transform_indices = @transform_1, window_bounds = array<i64: 128, 512>}, {transform_indices = @transform_2, window_bounds = array<i64: 1, 512>}, {transform_indices = @transform_3, window_bounds = array<i64: 512, 128>}, {pipeline_mode = #tpu.pipeline_mode<synchronous>, transform_indices = @transform_4, window_bounds = array<i64: 1, 128>}, {transform_indices = @transform_5, window_bounds = array<i64: 8, 128>}]} {
    %c0_i32 = arith.constant 0 : i32
    %0 = arith.cmpi eq, %arg1, %c0_i32 : i32
    %1 = arith.extui %0 : i1 to i32
    %c0_i32_0 = arith.constant 0 : i32
    %2 = arith.cmpi ne, %1, %c0_i32_0 : i32
    scf.if %2 {
      %cst_18 = arith.constant 0.000000e+00 : f32
      %25 = vector.broadcast %cst_18 : f32 to vector<8x128xf32>
      %c0_19 = arith.constant 0 : index
      %c0_20 = arith.constant 0 : index
      %26 = vector.load %arg8[%c0_19, %c0_20] : memref<8x128xf32, #tpu.memory_space<vmem>>, vector<8x128xf32>
      tpu.vector_store %arg8[%c0_19, %c0_20], %25 {strides = array<i32>} : memref<8x128xf32, #tpu.memory_space<vmem>>, vector<8x128xf32>,
    } else {
    }
    %c0 = arith.constant 0 : index
    %c0_1 = arith.constant 0 : index
    %3 = vector.load %arg2[%c0, %c0_1] : memref<8x128xf32, #tpu.memory_space<vmem>>, vector<8x128xf32>
    %c0_2 = arith.constant 0 : index
    %c0_3 = arith.constant 0 : index
    %4 = vector.load %arg3[%c0_2, %c0_3] : memref<128x512xf32, #tpu.memory_space<vmem>>, vector<128x512xf32>
    %cst = arith.constant dense<0.000000e+00> : vector<8x512xf32>
    %5 = tpu.matmul %3, %4, %cst {dimension_numbers = #tpu.dot_dimension_numbers<[1], [0], [0], [1], [0, 0, 1, 1], [], []>} : vector<8x128xf32>, vector<128x512xf32>, vector<8x512xf32> -> vector<8x512xf32>
    %c0_4 = arith.constant 0 : index
    %c0_5 = arith.constant 0 : index
    %6 = vector.load %arg4[%c0_4, %c0_5] : memref<1x512xf32, #tpu.memory_space<vmem>>, vector<1x512xf32>
    %7 = vector.broadcast %6 : vector<1x512xf32> to vector<8x512xf32>
    %8 = arith.addf %5, %7 : vector<8x512xf32>
    %cst_6 = arith.constant 5.000000e-01 : f32
    %9 = vector.broadcast %cst_6 : f32 to vector<8x512xf32>
    %10 = arith.mulf %9, %8 : vector<8x512xf32>
    %cst_7 = arith.constant 0.707106769 : f32
    %11 = vector.broadcast %cst_7 : f32 to vector<8x512xf32>
    %12 = arith.mulf %8, %11 : vector<8x512xf32>
    %13 = math.erf %12 : vector<8x512xf32>
    %cst_8 = arith.constant 1.000000e+00 : f32
    %14 = vector.broadcast %cst_8 : f32 to vector<8x512xf32>
    %15 = arith.addf %14, %13 : vector<8x512xf32>
    %16 = arith.mulf %10, %15 : vector<8x512xf32>
    %c0_9 = arith.constant 0 : index
    %c0_10 = arith.constant 0 : index
    %17 = vector.load %arg8[%c0_9, %c0_10] : memref<8x128xf32, #tpu.memory_space<vmem>>, vector<8x128xf32>
    %c0_11 = arith.constant 0 : index
    %c0_12 = arith.constant 0 : index
    %18 = vector.load %arg5[%c0_11, %c0_12] : memref<512x128xf32, #tpu.memory_space<vmem>>, vector<512x128xf32>
    %cst_13 = arith.constant dense<0.000000e+00> : vector<8x128xf32>
    %19 = tpu.matmul %16, %18, %cst_13 {dimension_numbers = #tpu.dot_dimension_numbers<[1], [0], [0], [1], [0, 0, 1, 1], [], []>} : vector<8x512xf32>, vector<512x128xf32>, vector<8x128xf32> -> vector<8x128xf32>
    %20 = arith.addf %17, %19 : vector<8x128xf32>
    %c0_14 = arith.constant 0 : index
    %c0_15 = arith.constant 0 : index
    %21 = vector.load %arg8[%c0_14, %c0_15] : memref<8x128xf32, #tpu.memory_space<vmem>>, vector<8x128xf32>
    tpu.vector_store %arg8[%c0_14, %c0_15], %20 {strides = array<i32>} : memref<8x128xf32, #tpu.memory_space<vmem>>, vector<8x128xf32>,
    %c0_i32_16 = arith.constant 0 : i32
    %22 = arith.cmpi eq, %arg1, %c0_i32_16 : i32
    %23 = arith.extui %22 : i1 to i32
    %c0_i32_17 = arith.constant 0 : i32
    %24 = arith.cmpi ne, %23, %c0_i32_17 : i32
    scf.if %24 {
      %c0_18 = arith.constant 0 : index
      %c0_19 = arith.constant 0 : index
      %25 = vector.load %arg8[%c0_18, %c0_19] : memref<8x128xf32, #tpu.memory_space<vmem>>, vector<8x128xf32>
      %c0_20 = arith.constant 0 : index
      %c0_21 = arith.constant 0 : index
      %26 = vector.load %arg6[%c0_20, %c0_21] : memref<1x128xf32, #tpu.memory_space<vmem>>, vector<1x128xf32>
      %27 = vector.broadcast %26 : vector<1x128xf32> to vector<8x128xf32>
      %28 = arith.addf %25, %27 : vector<8x128xf32>
      %c0_22 = arith.constant 0 : index
      %c0_23 = arith.constant 0 : index
      %29 = vector.load %arg7[%c0_22, %c0_23] : memref<8x128xf32, #tpu.memory_space<vmem>>, vector<8x128xf32>
      tpu.vector_store %arg7[%c0_22, %c0_23], %28 {strides = array<i32>} : memref<8x128xf32, #tpu.memory_space<vmem>>, vector<8x128xf32>,
    } else {
    }
    return
  }
  func.func @transform_0(%arg0: i32, %arg1: i32) -> (i32, i32) {
    %c0_i32 = arith.constant 0 : i32
    %c0_i32_0 = arith.constant 0 : i32
    return %arg0, %c0_i32 : i32, i32
  }
  func.func @transform_1(%arg0: i32, %arg1: i32) -> (i32, i32) {
    %c0_i32 = arith.constant 0 : i32
    %c0_i32_0 = arith.constant 0 : i32
    return %c0_i32, %arg1 : i32, i32
  }
  func.func @transform_2(%arg0: i32, %arg1: i32) -> (i32, i32) {
    %c0_i32 = arith.constant 0 : i32
    %c0_i32_0 = arith.constant 0 : i32
    return %c0_i32, %arg1 : i32, i32
  }
  func.func @transform_3(%arg0: i32, %arg1: i32) -> (i32, i32) {
    %c0_i32 = arith.constant 0 : i32
    %c0_i32_0 = arith.constant 0 : i32
    return %arg1, %c0_i32 : i32, i32
  }
  func.func @transform_4(%arg0: i32, %arg1: i32) -> (i32, i32) {
    %c0_i32 = arith.constant 0 : i32
    %c0_i32_0 = arith.constant 0 : i32
    %c0_i32_1 = arith.constant 0 : i32
    return %c0_i32, %c0_i32_0 : i32, i32
  }
  func.func @transform_5(%arg0: i32, %arg1: i32) -> (i32, i32) {
    %c0_i32 = arith.constant 0 : i32
    %c0_i32_0 = arith.constant 0 : i32
    return %arg0, %c0_i32 : i32, i32
  }
}

</mosaic_0001>

<bundles_post_ra>
// kernel: tpu_custom_call.1
= control target key start
LH: loop header
LB: loop body
LE: loop exit
PB: predicated region body
PF: predicated region fallthrough
CT: control target
= control target key end

     0   :  { %s1550_s0 = inlined_call_operand.hbm [shape: f32[16,128], index: 0, kind: input, shape index: {}]   ;;  %s1551_s1 = inlined_call_operand.hbm [shape: f32[128,512], index: 1, kind: input, shape index: {}]   ;;  %s1552_s2 = inlined_call_operand.hbm [shape: f32[1,512], index: 2, kind: input, shape index: {}]   ;;  %s1553_s3 = inlined_call_operand.hbm [shape: f32[512,128], index: 3, kind: input, shape index: {}]   ;;  %s1554_s4 = inlined_call_operand.vmem [shape: f32[1,128], index: 4, kind: input, shape index: {}]   ;;  %s1555_s5 = inlined_call_operand.hbm [shape: f32[16,128], index: 5, kind: output, shape index: {}]  }
   0x1   :  { %1560 = sst [smem:[#allocation16_spill]] %s1551_s1 }
   0x2   :  { %10 = vsyncpa [#allocation4], 0 }
   0x3   :  { %12 = vsyncpa [#allocation4 + $0x1], 0 }
   0x4   :  { %13 = vsyncpa [#allocation7], 0 }
   0x5   :  { %14 = vsyncpa [#allocation10], 0 }
   0x6   :  { %15 = vsyncpa [#allocation5], 0 }
   0x7   :  { %17 = vsyncpa [#allocation5 + $0x1], 0  ;;  %s1354_s18 = smov 0   ;;  %s1356_s19 = smov 0  }
   0x8   :  { %s1358_s20 = smov 0   ;;  %s1360_s21 = smov 0  }
   0x9   :  { %s1362_s22 = smov 0   ;;  %s1364_s23 = smov 0  }
   0xa LB: > { %s922_s24 = sadd.s32 4294967295, %s1312_s23   ;;  %s923_s25 = sadd.s32 4294967294, %s1312_s23   ;;  %s1312_s23 = sphi %s1364_s23, %s23_s23   ;;  %s1308_s22 = sphi %s1362_s22, %s1579_s22   ;;  %s1304_s21 = sphi %s1360_s21, %s1578_s21   ;;  %s1300_s20 = sphi %s1358_s20, %s1577_s20   ;;  %s1296_s19 = sphi %s1356_s19, %s1576_s19   ;;  %s1292_s18 = sphi %s1354_s18, %s1575_s18  }
   0xb   : > { %p55_p0 = scmp.ne.s32.totalorder %s1296_s19, %s1292_s18  ;;  %p1388_p1 = scmp.eq.s32.totalorder %s922_s24, 0 }
   0xc   : > { %p1392_p2 = scmp.eq.s32.totalorder %s922_s24, 1  ;;  %p184_p3 = scmp.eq.s32.totalorder %s923_s25, 1 }
   0xd   : > { %s1561_s26 = scalar_select %p1388_p1, 1, 0 }
   0xe   : > { %p1398_p4 = por %p1388_p1, %p55_p0  ;;  %p924_p5 = scmp.ge.s32.totalorder %s1312_s23, 1 }
   0xf   : > { %p1403_p6 = por %p184_p3, %p55_p0  ;;  %p191_p7 = scmp.lt.s32.totalorder %s1312_s23, 3 }
  0x10   : > { %s1563_s28 = scalar_select %p1398_p4, 1, 0 }
  0x11   : > { %s1564_s29 = scalar_select %p1403_p6, 1, 0 }
  0x12   : > { %p1408_p8 = pnand %p924_p5, %p191_p7  ;;  %s1314_s6 = smov [#allocation6]  }
  0x13   : > { %s206_s7 = sshll.u32 %s1314_s6, 4  ;;  %s1315_s9 = smov [#allocation8]   ;;  %s207_s7 = int_to_ptr.vmem [resolvable:$true] %s206_s7 }
  0x14   : > { %s1565_s30 = scalar_select %p1408_p8, 1, 0 }
  0x15   : > { %p1028_p9 = pneg %p1408_p8  ;;  %s223_s10 = sshll.u32 %s1315_s9, 4  ;;  %s224_s10 = int_to_ptr.vmem [resolvable:$true] %s223_s10 }
  0x16   : > { %s1316_s11 = smov [#allocation9]   ;;  %s1129_s13 = scalar_lea.vmem %s207_s7, 8192 }
  0x17   : > { %p1417_p11 = pnand %p1028_p9, %p1388_p1  ;;  %s236_s12 = sshll.u32 %s1316_s11, 4  ;;  %s237_s12 = int_to_ptr.vmem [resolvable:$true] %s236_s12 }
  0x18   : > { %p1130_p13 = scmp.ne.s32.totalorder %s207_s7, %s1129_s13  ;;  %p1137_p5 = scmp.lt.s32.totalorder %s207_s7, %s207_s7 }
  0x19   : > { %p1120_p12 = pneg %p1417_p11  ;;  %p1138_p7 = scmp.lt.s32.totalorder %s1129_s13, %s1129_s13 }
  0x1b   : > { %p1132_p0 = pnand %p1130_p13, %p1120_p12  ;;  %p1139_p9 = por %p1138_p7, %p1137_p5 }
  0x1d   : > { %p1133_p3 = pneg %p1132_p0 }
  0x1f   : > { %p1140_p10 = pnand %p1139_p9, %p1133_p3 }
  0x21   : > { %1143 = shalt.err (!%p1140_p10)
}
  0x22   : > { %s1317_s14 = smov 512   ;;  %s1318_s15 = smov 32  }
  0x23   : > { %s1567_s1 = sld [smem:[#allocation16_spill]]  ;;  %s1155_s24 = scalar_lea.vmem %s224_s10, 64 }
  0x24   : > { %p1156_p6 = scmp.ne.s32.totalorder %s224_s10, %s1155_s24  ;;  %p1163_p1 = scmp.lt.s32.totalorder %s224_s10, %s224_s10 }
  0x25   : > { %p1164_p4 = scmp.lt.s32.totalorder %s1155_s24, %s1155_s24 }
  0x26   : > { %p1158_p13 = pnand %p1156_p6, %p1120_p12 }
  0x27   : > { %p1165_p5 = por %p1164_p4, %p1163_p1 }
  0x28   : > { %p1159_p0 = pneg %p1158_p13 }
  0x29   : > { %1031 = dma.hbm_to_vmem [thread:$0]  (!%p1417_p11), %s1567_s1, 8192, %s207_s7, [#allocation7], %s1317_s14, %s1317_s14, %s1318_s15  }
  0x2a   : > { %p1166_p3 = pnand %p1165_p5, %p1159_p0 }
  0x2c   : > { %1169 = shalt.err (!%p1166_p3)
}
  0x2d   : > { %1034 = dma.hbm_to_vmem [thread:$0]  (!%p1417_p11), %s1552_s2, 64, %s224_s10, [#allocation7]  }
  0x2e   : > { %s1181_s7 = scalar_lea.vmem %s237_s12, 8192  ;;  %p1189_p9 = scmp.lt.s32.totalorder %s237_s12, %s237_s12 }
  0x2f   : > { %p1182_p10 = scmp.ne.s32.totalorder %s237_s12, %s1181_s7  ;;  %p1190_p13 = scmp.lt.s32.totalorder %s1181_s7, %s1181_s7 }
  0x31   : > { %p1184_p7 = pnand %p1182_p10, %p1120_p12  ;;  %p1191_p8 = por %p1190_p13, %p1189_p9 }
  0x33   : > { %p1185_p6 = pneg %p1184_p7 }
  0x35   : > { %p1192_p1 = pnand %p1191_p8, %p1185_p6 }
  0x37   : > { %1195 = shalt.err (!%p1192_p1)
}
  0x38   : > { %s1319_s9 = smov 128   ;;  %s1320_s10 = smov 8  }
  0x39   : > { %1037 = dma.hbm_to_vmem [thread:$0]  (!%p1417_p11), %s1553_s3, 8192, %s237_s12, [#allocation10], %s1319_s9, %s1319_s9, %s1320_s10  }
  0x3a   : > { %s42_s14 = sadd.s32 1, %s1300_s20  ;;  %s35_s15 = sadd.s32 1, %s1308_s22 }
  0x3b   : > { %p49_p4 = scmp.ne.s32.totalorder %s1300_s20, %s1296_s19  ;;  %p37_p8 = scmp.ge.s32.totalorder %s35_s15, 2 }
  0x3c   : > { %p50_p12 = scmp.eq.s32.totalorder %s1312_s23, 0  ;;  %p1049_p5 = scmp.lt.s32.totalorder %s1312_s23, 2 }
  0x3d   : > { %p1454_p0 = por %p1392_p2, %p49_p4  ;;  %s1581_s15 = smov (%p37_p8, %s35_s15), 0 }
  0x3e   : > { %p51_p3 = por %p50_p12, %p49_p4  ;;  %s253_s8 = sand.u32 1, %s1300_s20  }
  0x3f   : > { %s39_s17 = ssub.s32 %s1308_s22, %s1581_s15  ;;  %s929_s12 = sshll.u32 %s253_s8, 3 }
  0x40   : > { %p40_p10 = scmp.eq.s32.totalorder %s39_s17, 0  ;;  %s930_s24 = sshll.u32 %s1308_s22, 7 }
  0x41   : > { %s262_s27 = scalar_lea.hbm %s1550_s0, %s930_s24  ;;  %s257_s9 = scalar_lea.vmem [#allocation3], %s929_s12 }
  0x42   : > { %s1466_s25 = scalar_select %p40_p10, %s1300_s20, %s42_s14  }
  0x43   : > { %s264_s10 = sshll.u32 %s257_s9, 4  ;;  %p1473_p2 = pnand %p1049_p5, %p51_p3  ;;  %s265_s10 = int_to_ptr.vmem [resolvable:$true] %s264_s10 }
  0x44   : > { %s254_s13 = scalar_lea.sflag [#allocation4], %s253_s8  ;;  %s1209_s17 = scalar_lea.vmem %s265_s10, 128 }
  0x45   : > { %p1198_p11 = pneg %p1473_p2  ;;  %p1210_p7 = scmp.ne.s32.totalorder %s265_s10, %s1209_s17 }
  0x46   : > { %s1321_s14 = smov [#allocation3]  }
  0x47   : > { %p1212_p6 = pnand %p1210_p7, %p1198_p11  ;;  %s1214_s1 = sshll.u32 %s1321_s14, 4  ;;  %s1215_s1 = int_to_ptr.vmem [resolvable:$false] %s1214_s1 }
  0x48   : > { %s1216_s24 = scalar_lea.vmem %s1215_s1, 256  ;;  %p1217_p13 = scmp.lt.s32.totalorder %s265_s10, %s1215_s1 }
  0x49   : > { %p1213_p9 = pneg %p1212_p6  ;;  %p1218_p1 = scmp.lt.s32.totalorder %s1216_s24, %s1209_s17 }
  0x4b   : > { %p1219_p4 = por %p1218_p1, %p1217_p13 }
  0x4d   : > { %p1220_p8 = pnand %p1219_p4, %p1213_p9 }
  0x4f   : > { %1223 = shalt.err (!%p1220_p8)
}
  0x50   : > { %1041 = dma.hbm_to_vmem [thread:$0]  (!%p1473_p2), %s262_s27, 128, %s265_s10, %s254_s13  }
  0x51   : > { %p1570_p12 = scmp.ne.s32.totalorder %s1565_s30, 0 }
  0x52   : > { %s1484_s8 = sand.u32 (!%p1570_p12), 1, %s1296_s19   ;;  %p1571_p5 = scmp.ne.s32.totalorder (!%p1570_p12), %s1563_s28, 0 }
  0x53   : > { %273 = sbr.rel (%p1570_p12) target bundleno = 561 (0x231), region = 40  ;;  %s932_s12 = sshll.u32 (!%p1570_p12), %s1484_s8, 3 }
  0x54   : > { %s276_s6 = scalar_lea.sflag (!%p1570_p12), [#allocation4], %s1484_s8  ;;  %s1490_s1 = scalar_lea.vmem (!%p1570_p12), [#allocation3], %s932_s12 }
  0x58   : > { %1275 = dma.done.wait (%p1571_p5), %s276_s6, 128  }
  0x59   : > { %1277 = vsyncadd (%p1571_p5), %s276_s6, 4294967168  ;;  %p1572_p3 = scmp.ne.s32.totalorder %s1561_s26, 0 }
  0x5b   : > { %1279 = dma.done.wait (%p1572_p3), [#allocation7], 8256  }
  0x5c   : > { %1281 = vsyncadd (%p1572_p3), [#allocation7], 4294959040 }
  0x5d   : > { %1283 = dma.done.wait (%p1572_p3), [#allocation10], 8192  }
  0x5e   : > { %1285 = vsyncadd (%p1572_p3), [#allocation10], 4294959104  ;;  %v1322_v0 = vmov 0.0   ;;  %v388_v1 = vld [vmem:[#allocation6 + $0x1e8] sm:$0xff]  ;;  %v390_v2 = vld [vmem:[#allocation6 + $0x1f8] sm:$0xff]  ;;  %s939_s30 = sshll.u32 %s1304_s21, 7 }
  0x5f   : > { %477 = vmatprep.mubr.f32.mxu0 %v1322_v0  ;;  %548 = vmatprep.mubr.f32.mxu1 %v1322_v0  ;;  %v387_v3 = vld [vmem:[#allocation6 + $0x1e0] sm:$0xff]  ;;  %v389_v4 = vld [vmem:[#allocation6 + $0x1f0] sm:$0xff]  ;;  %v384_v5 = vld [vmem:[#allocation6 + $0x1c8] sm:$0xff]  ;;  %s317_s7 = scalar_lea.vmem [#allocation11], %s932_s12  ;;  %s807_s11 = scalar_lea.hbm %s1555_s5, %s939_s30 }
  0x60   : > { %413 = vmatprep.subr.mxu0 %v388_v1  ;;  %484 = vmatprep.subr.mxu1 %v390_v2  ;;  %v386_v6 = vld [vmem:[#allocation6 + $0x1d8] sm:$0xff]  ;;  %v383_v7 = vld [vmem:[#allocation6 + $0x1c0] sm:$0xff]  ;;  %v385_v8 = vld [vmem:[#allocation6 + $0x1d0] sm:$0xff]  ;;  %s809_s27 = sshll.u32 %s317_s7, 4  ;;  %s796_s13 = scalar_lea.sflag [#allocation5], %s1484_s8  ;;  %s810_s27 = int_to_ptr.vmem [resolvable:$true] %s809_s27 }
  0x61   : > { %414 = vmatpush1.msra.mxu0 %v387_v3  ;;  %485 = vmatpush1.msra.mxu1 %v389_v4  ;;  %v380_v9 = vld [vmem:[#allocation6 + $0x1a8] sm:$0xff]  ;;  %v382_v10 = vld [vmem:[#allocation6 + $0x1b8] sm:$0xff]  ;;  %v379_v11 = vld [vmem:[#allocation6 + $0x1a0] sm:$0xff]  ;;  %s1224_s17 = scalar_lea.vmem %s810_s27, 128  ;;  %s1323_s14 = smov [#allocation11]  }
  0x62   : > { %415 = vmatprep.subr.mxu0 %v384_v5  ;;  %486 = vmatprep.subr.mxu1 %v386_v6  ;;  %v381_v12 = vld [vmem:[#allocation6 + $0x1b0] sm:$0xff]  ;;  %v376_v13 = vld [vmem:[#allocation6 + $0x188] sm:$0xff]  ;;  %v378_v14 = vld [vmem:[#allocation6 + $0x198] sm:$0xff]  ;;  %p1225_p10 = scmp.ne.s32.totalorder %s810_s27, %s1224_s17  ;;  %s1228_s24 = sshll.u32 %s1323_s14, 4  ;;  %s1229_s24 = int_to_ptr.vmem [resolvable:$false] %s1228_s24 }
  0x63   : > { %416 = vmatpush1.msra.mxu0 %v383_v7  ;;  %487 = vmatpush1.msra.mxu1 %v385_v8  ;;  %v375_v15 = vld [vmem:[#allocation6 + $0x180] sm:$0xff]  ;;  %v377_v16 = vld [vmem:[#allocation6 + $0x190] sm:$0xff]  ;;  %v372_v17 = vld [vmem:[#allocation6 + $0x168] sm:$0xff]  ;;  %s1230_s21 = scalar_lea.vmem %s1229_s24, 256  ;;  %p1231_p7 = scmp.lt.s32.totalorder %s810_s27, %s1229_s24 }
  0x64   : > { %417 = vmatprep.subr.mxu0 %v380_v9  ;;  %488 = vmatprep.subr.mxu1 %v382_v10  ;;  %v374_v18 = vld [vmem:[#allocation6 + $0x178] sm:$0xff]  ;;  %v371_v19 = vld [vmem:[#allocation6 + $0x160] sm:$0xff]  ;;  %v373_v20 = vld [vmem:[#allocation6 + $0x170] sm:$0xff]  ;;  %p1226_p2 = pnand %p1225_p10, %p1454_p0  ;;  %p1232_p6 = scmp.lt.s32.totalorder %s1230_s21, %s1224_s17 }
  0x65   : > { %418 = vmatpush1.msra.mxu0 %v379_v11  ;;  %489 = vmatpush1.msra.mxu1 %v381_v12  ;;  %v368_v21 = vld [vmem:[#allocation6 + $0x148] sm:$0xff]  ;;  %v370_v22 = vld [vmem:[#allocation6 + $0x158] sm:$0xff]  ;;  %v367_v23 = vld [vmem:[#allocation6 + $0x140] sm:$0xff] }
  0x66   : > { %419 = vmatprep.subr.mxu0 %v376_v13  ;;  %490 = vmatprep.subr.mxu1 %v378_v14  ;;  %v369_v24 = vld [vmem:[#allocation6 + $0x150] sm:$0xff]  ;;  %v364_v25 = vld [vmem:[#allocation6 + $0x128] sm:$0xff]  ;;  %v366_v26 = vld [vmem:[#allocation6 + $0x138] sm:$0xff]  ;;  %p1227_p11 = pneg %p1226_p2  ;;  %p1233_p9 = por %p1232_p6, %p1231_p7 }
  0x67   : > { %420 = vmatpush1.msra.mxu0 %v375_v15  ;;  %491 = vmatpush1.msra.mxu1 %v377_v16  ;;  %v363_v27 = vld [vmem:[#allocation6 + $0x120] sm:$0xff]  ;;  %v365_v28 = vld [vmem:[#allocation6 + $0x130] sm:$0xff]  ;;  %v360_v29 = vld [vmem:[#allocation6 + $0x108] sm:$0xff] }
  0x68   : > { %421 = vmatprep.subr.mxu0 %v372_v17  ;;  %492 = vmatprep.subr.mxu1 %v374_v18  ;;  %v362_v30 = vld [vmem:[#allocation6 + $0x118] sm:$0xff]  ;;  %v359_v31 = vld [vmem:[#allocation6 + $0x100] sm:$0xff]  ;;  %v361_v32 = vld [vmem:[#allocation6 + $0x110] sm:$0xff]  ;;  %p1234_p13 = pnand %p1233_p9, %p1227_p11 }
  0x69   : > { %422 = vmatpush1.msra.mxu0 %v371_v19  ;;  %493 = vmatpush1.msra.mxu1 %v373_v20  ;;  %v356_v33 = vld [vmem:[#allocation6 + $0xe8] sm:$0xff]  ;;  %v358_v34 = vld [vmem:[#allocation6 + $0xf8] sm:$0xff]  ;;  %v355_v35 = vld [vmem:[#allocation6 + $0xe0] sm:$0xff] }
  0x6a   : > { %423 = vmatprep.subr.mxu0 %v368_v21  ;;  %494 = vmatprep.subr.mxu1 %v370_v22  ;;  %v357_v36 = vld [vmem:[#allocation6 + $0xf0] sm:$0xff]  ;;  %v352_v37 = vld [vmem:[#allocation6 + $0xc8] sm:$0xff]  ;;  %v354_v38 = vld [vmem:[#allocation6 + $0xd8] sm:$0xff] }
  0x6b   : > { %424 = vmatpush1.msra.mxu0 %v367_v23  ;;  %495 = vmatpush1.msra.mxu1 %v369_v24  ;;  %v351_v39 = vld [vmem:[#allocation6 + $0xc0] sm:$0xff]  ;;  %v353_v40 = vld [vmem:[#allocation6 + $0xd0] sm:$0xff]  ;;  %v348_v41 = vld [vmem:[#allocation6 + $0xa8] sm:$0xff] }
  0x6c   : > { %425 = vmatprep.subr.mxu0 %v364_v25  ;;  %496 = vmatprep.subr.mxu1 %v366_v26  ;;  %v350_v42 = vld [vmem:[#allocation6 + $0xb8] sm:$0xff]  ;;  %v347_v43 = vld [vmem:[#allocation6 + $0xa0] sm:$0xff]  ;;  %v349_v44 = vld [vmem:[#allocation6 + $0xb0] sm:$0xff] }
  0x6d   : > { %426 = vmatpush1.msra.mxu0 %v363_v27  ;;  %497 = vmatpush1.msra.mxu1 %v365_v28  ;;  %v344_v45 = vld [vmem:[#allocation6 + $0x88] sm:$0xff]  ;;  %v346_v46 = vld [vmem:[#allocation6 + $0x98] sm:$0xff]  ;;  %v343_v47 = vld [vmem:[#allocation6 + $0x80] sm:$0xff] }
  0x6e   : > { %427 = vmatprep.subr.mxu0 %v360_v29  ;;  %498 = vmatprep.subr.mxu1 %v362_v30  ;;  %v345_v48 = vld [vmem:[#allocation6 + $0x90] sm:$0xff]  ;;  %v340_v49 = vld [vmem:[#allocation6 + $0x68] sm:$0xff]  ;;  %v342_v50 = vld [vmem:[#allocation6 + $0x78] sm:$0xff] }
  0x6f   : > { %428 = vmatpush1.msra.mxu0 %v359_v31  ;;  %499 = vmatpush1.msra.mxu1 %v361_v32  ;;  %v339_v51 = vld [vmem:[#allocation6 + $0x60] sm:$0xff]  ;;  %v341_v52 = vld [vmem:[#allocation6 + $0x70] sm:$0xff]  ;;  %v336_v53 = vld [vmem:[#allocation6 + $0x48] sm:$0xff] }
  0x70   : > { %429 = vmatprep.subr.mxu0 %v356_v33  ;;  %500 = vmatprep.subr.mxu1 %v358_v34  ;;  %v338_v54 = vld [vmem:[#allocation6 + $0x58] sm:$0xff]  ;;  %v335_v55 = vld [vmem:[#allocation6 + $0x40] sm:$0xff]  ;;  %v337_v56 = vld [vmem:[#allocation6 + $0x50] sm:$0xff] }
  0x71   : > { %430 = vmatpush1.msra.mxu0 %v355_v35  ;;  %501 = vmatpush1.msra.mxu1 %v357_v36  ;;  %v332_v57 = vld [vmem:[#allocation6 + $0x28] sm:$0xff]  ;;  %v334_v58 = vld [vmem:[#allocation6 + $0x38] sm:$0xff]  ;;  %v331_v59 = vld [vmem:[#allocation6 + $0x20] sm:$0xff] }
  0x72   : > { %431 = vmatprep.subr.mxu0 %v352_v37  ;;  %502 = vmatprep.subr.mxu1 %v354_v38  ;;  %v333_v60 = vld [vmem:[#allocation6 + $0x30] sm:$0xff]  ;;  %v328_v61 = vld [vmem:[#allocation6 + $0x8] sm:$0xff]  ;;  %v330_v62 = vld [vmem:[#allocation6 + $0x18] sm:$0xff] }
  0x73   : > { %432 = vmatpush1.msra.mxu0 %v351_v39  ;;  %503 = vmatpush1.msra.mxu1 %v353_v40  ;;  %v327_v63 = vld [vmem:[#allocation6] sm:$0xff]  ;;  %v329_v0 = vld [vmem:[#allocation6 + $0x10] sm:$0xff] }
  0x74   : > { %433 = vmatprep.subr.mxu0 %v348_v41  ;;  %504 = vmatprep.subr.mxu1 %v350_v42  ;;  %v326_v1 = vld [vmem:[%s1490_s1] sm:$0xff]  ;;  %v604_v14 = vld [vmem:[#allocation9 + $0xe0] sm:$0xff] }
  0x75   : > { %434 = vmatpush1.msra.mxu0 %v347_v43  ;;  %505 = vmatpush1.msra.mxu1 %v349_v44  ;;  %v607_v2 = vld [vmem:[#allocation9 + $0xf8] sm:$0xff]  ;;  %v606_v6 = vld [vmem:[#allocation9 + $0xf0] sm:$0xff]  ;;  %v605_v10 = vld [vmem:[#allocation9 + $0xe8] sm:$0xff] }
  0x76   : > { %435 = vmatprep.subr.mxu0 %v344_v45  ;;  %506 = vmatprep.subr.mxu1 %v346_v46  ;;  %v639_v3 = vld [vmem:[#allocation9 + $0x1f8] sm:$0xff]  ;;  %v638_v7 = vld [vmem:[#allocation9 + $0x1f0] sm:$0xff]  ;;  %v637_v11 = vld [vmem:[#allocation9 + $0x1e8] sm:$0xff] }
  0x77   : > { %436 = vmatpush1.msra.mxu0 %v343_v47  ;;  %507 = vmatpush1.msra.mxu1 %v345_v48  ;;  %v591_v4 = vld [vmem:[#allocation9 + $0x78] sm:$0xff]  ;;  %v590_v8 = vld [vmem:[#allocation9 + $0x70] sm:$0xff]  ;;  %v589_v12 = vld [vmem:[#allocation9 + $0x68] sm:$0xff] }
  0x78   : > { %437 = vmatprep.subr.mxu0 %v340_v49  ;;  %508 = vmatprep.subr.mxu1 %v342_v50  ;;  %v623_v5 = vld [vmem:[#allocation9 + $0x178] sm:$0xff]  ;;  %v622_v9 = vld [vmem:[#allocation9 + $0x170] sm:$0xff]  ;;  %v621_v13 = vld [vmem:[#allocation9 + $0x168] sm:$0xff] }
  0x79   : > { %438 = vmatpush1.msra.mxu0 %v339_v51  ;;  %509 = vmatpush1.msra.mxu1 %v341_v52  ;;  %v636_v15 = vld [vmem:[#allocation9 + $0x1e0] sm:$0xff]  ;;  %v603_v18 = vld [vmem:[#allocation9 + $0xd8] sm:$0xff]  ;;  %v602_v22 = vld [vmem:[#allocation9 + $0xd0] sm:$0xff] }
  0x7a   : > { %439 = vmatprep.subr.mxu0 %v336_v53  ;;  %510 = vmatprep.subr.mxu1 %v338_v54  ;;  %v588_v16 = vld [vmem:[#allocation9 + $0x60] sm:$0xff]  ;;  %v635_v19 = vld [vmem:[#allocation9 + $0x1d8] sm:$0xff]  ;;  %v634_v23 = vld [vmem:[#allocation9 + $0x1d0] sm:$0xff] }
  0x7b   : > { %440 = vmatpush1.msra.mxu0 %v335_v55  ;;  %511 = vmatpush1.msra.mxu1 %v337_v56  ;;  %v620_v17 = vld [vmem:[#allocation9 + $0x160] sm:$0xff]  ;;  %v587_v20 = vld [vmem:[#allocation9 + $0x58] sm:$0xff]  ;;  %v586_v24 = vld [vmem:[#allocation9 + $0x50] sm:$0xff] }
  0x7c   : > { %441 = vmatprep.subr.mxu0 %v332_v57  ;;  %512 = vmatprep.subr.mxu1 %v334_v58  ;;  %v619_v21 = vld [vmem:[#allocation9 + $0x158] sm:$0xff]  ;;  %v618_v25 = vld [vmem:[#allocation9 + $0x150] sm:$0xff]  ;;  %v601_v26 = vld [vmem:[#allocation9 + $0xc8] sm:$0xff] }
  0x7d   : > { %442 = vmatpush1.msra.mxu0 %v331_v59  ;;  %513 = vmatpush1.msra.mxu1 %v333_v60  ;;  %v633_v27 = vld [vmem:[#allocation9 + $0x1c8] sm:$0xff]  ;;  %v600_v30 = vld [vmem:[#allocation9 + $0xc0] sm:$0xff]  ;;  %v599_v34 = vld [vmem:[#allocation9 + $0xb8] sm:$0xff] }
  0x7e   : > { %443 = vmatprep.subr.mxu0 %v328_v61  ;;  %514 = vmatprep.subr.mxu1 %v330_v62  ;;  %v585_v28 = vld [vmem:[#allocation9 + $0x48] sm:$0xff]  ;;  %v632_v31 = vld [vmem:[#allocation9 + $0x1c0] sm:$0xff]  ;;  %v631_v35 = vld [vmem:[#allocation9 + $0x1b8] sm:$0xff] }
  0x7f   : > { %444 = vmatpush1.msra.mxu0 %v327_v63  ;;  %515 = vmatpush1.msra.mxu1 %v329_v0  ;;  %v617_v29 = vld [vmem:[#allocation9 + $0x148] sm:$0xff]  ;;  %v584_v32 = vld [vmem:[#allocation9 + $0x40] sm:$0xff]  ;;  %v583_v36 = vld [vmem:[#allocation9 + $0x38] sm:$0xff] }
  0x80   : > { %478 = vmatmul.mubr.f32.vlgmr.msra.gmra.mxu0 %v326_v1  ;;  %549 = vmatmul.mubr.f32.vlgmr.msra.gmra.mxu1 %v326_v1  ;;  %v616_v33 = vld [vmem:[#allocation9 + $0x140] sm:$0xff]  ;;  %v615_v37 = vld [vmem:[#allocation9 + $0x138] sm:$0xff]  ;;  %v598_v38 = vld [vmem:[#allocation9 + $0xb0] sm:$0xff] }
  0x81   : > { %942 = vmatprep.subr.mxu0 %v607_v2  ;;  %977 = vmatprep.subr.mxu1 %v639_v3  ;;  %v630_v39 = vld [vmem:[#allocation9 + $0x1b0] sm:$0xff]  ;;  %v597_v42 = vld [vmem:[#allocation9 + $0xa8] sm:$0xff]  ;;  %v596_v46 = vld [vmem:[#allocation9 + $0xa0] sm:$0xff]  ;;  %v393_v2 = vlaneseq }
  0x82   : > { %943 = vmatpush3.msra.mxu0 %v591_v4  ;;  %978 = vmatpush3.msra.mxu1 %v623_v5  ;;  %v582_v40 = vld [vmem:[#allocation9 + $0x30] sm:$0xff]  ;;  %v629_v43 = vld [vmem:[#allocation9 + $0x1a8] sm:$0xff]  ;;  %v628_v47 = vld [vmem:[#allocation9 + $0x1a0] sm:$0xff] }
  0x83   : > { %944 = vmatprep.subr.mxu0 %v606_v6  ;;  %979 = vmatprep.subr.mxu1 %v638_v7  ;;  %v614_v41 = vld [vmem:[#allocation9 + $0x130] sm:$0xff]  ;;  %v581_v44 = vld [vmem:[#allocation9 + $0x28] sm:$0xff]  ;;  %v580_v48 = vld [vmem:[#allocation9 + $0x20] sm:$0xff]  ;;  %v394_v3 = vshrl.u32 %v393_v2, 7 }
  0x84   : > { %945 = vmatpush3.msra.mxu0 %v590_v8  ;;  %980 = vmatpush3.msra.mxu1 %v622_v9  ;;  %v613_v45 = vld [vmem:[#allocation9 + $0x128] sm:$0xff]  ;;  %v612_v49 = vld [vmem:[#allocation9 + $0x120] sm:$0xff]  ;;  %v595_v50 = vld [vmem:[#allocation9 + $0x98] sm:$0xff] }
  0x85   : > { %946 = vmatprep.subr.mxu0 %v605_v10  ;;  %981 = vmatprep.subr.mxu1 %v637_v11  ;;  %v627_v51 = vld [vmem:[#allocation9 + $0x198] sm:$0xff]  ;;  %v594_v54 = vld [vmem:[#allocation9 + $0x90] sm:$0xff]  ;;  %v593_v58 = vld [vmem:[#allocation9 + $0x88] sm:$0xff]  ;;  %v395_v4 = vsub.s32 0, %v394_v3  ;;  %v403_v5 = vsub.s32 2, %v394_v3  ;;  %v399_v7 = vsub.s32 1, %v394_v3 }
  0x86   : > { %947 = vmatpush3.msra.mxu0 %v589_v12  ;;  %982 = vmatpush3.msra.mxu1 %v621_v13  ;;  %v579_v52 = vld [vmem:[#allocation9 + $0x18] sm:$0xff]  ;;  %v626_v55 = vld [vmem:[#allocation9 + $0x190] sm:$0xff]  ;;  %v625_v59 = vld [vmem:[#allocation9 + $0x188] sm:$0xff]  ;;  %v407_v8 = vsub.s32 3, %v394_v3 }
  0x87   : > { %948 = vmatprep.subr.mxu0 %v604_v14  ;;  %983 = vmatprep.subr.mxu1 %v636_v15  ;;  %v611_v53 = vld [vmem:[#allocation9 + $0x118] sm:$0xff]  ;;  %v578_v56 = vld [vmem:[#allocation9 + $0x10] sm:$0xff]  ;;  %v577_v60 = vld [vmem:[#allocation9 + $0x8] sm:$0xff] }
  0x88   : > { %949 = vmatpush3.msra.mxu0 %v588_v16  ;;  %984 = vmatpush3.msra.mxu1 %v620_v17  ;;  %v610_v57 = vld [vmem:[#allocation9 + $0x110] sm:$0xff]  ;;  %v609_v61 = vld [vmem:[#allocation9 + $0x108] sm:$0xff]  ;;  %v592_v62 = vld [vmem:[#allocation9 + $0x80] sm:$0xff] }
  0x89   : > { %950 = vmatprep.subr.mxu0 %v603_v18  ;;  %985 = vmatprep.subr.mxu1 %v635_v19  ;;  %v624_v63 = vld [vmem:[#allocation9 + $0x180] sm:$0xff]  ;;  %v391_v6 = vld [vmem:[#allocation8] sm:$0xf] }
  0x8a   : > { %951 = vmatpush3.msra.mxu0 %v587_v20  ;;  %986 = vmatpush3.msra.mxu1 %v619_v21  ;;  %v576_v0 = vld [vmem:[#allocation9] sm:$0xff]  ;;  %v396_v9 = vrot.slane %v391_v6, %v395_v4  ;;  %v404_v10 = vrot.slane %v391_v6, %v403_v5  ;;  %v400_v13 = vrot.slane %v391_v6, %v399_v7 }
  0x8b   : > { %952 = vmatprep.subr.mxu0 %v602_v22  ;;  %987 = vmatprep.subr.mxu1 %v634_v23  ;;  %v608_v1 = vld [vmem:[#allocation9 + $0x100] sm:$0xff]  ;;  %v408_v14 = vrot.slane %v391_v6, %v407_v8 }
  0x8c   : > { %953 = vmatpush3.msra.mxu0 %v586_v24  ;;  %988 = vmatpush3.msra.mxu1 %v618_v25 }
  0x8d   : > { %954 = vmatprep.subr.mxu0 %v601_v26  ;;  %989 = vmatprep.subr.mxu1 %v633_v27 }
  0x8e   : > { %955 = vmatpush3.msra.mxu0 %v585_v28  ;;  %990 = vmatpush3.msra.mxu1 %v617_v29 }
  0x8f   : > { %956 = vmatprep.subr.mxu0 %v600_v30  ;;  %991 = vmatprep.subr.mxu1 %v632_v31 }
  0x90   : > { %957 = vmatpush3.msra.mxu0 %v584_v32  ;;  %992 = vmatpush3.msra.mxu1 %v616_v33 }
  0x91   : > { %958 = vmatprep.subr.mxu0 %v599_v34  ;;  %993 = vmatprep.subr.mxu1 %v631_v35 }
  0x92   : > { %959 = vmatpush3.msra.mxu0 %v583_v36  ;;  %994 = vmatpush3.msra.mxu1 %v615_v37 }
  0x93   : > { %960 = vmatprep.subr.mxu0 %v598_v38  ;;  %995 = vmatprep.subr.mxu1 %v630_v39 }
  0x94   : > { %961 = vmatpush3.msra.mxu0 %v582_v40  ;;  %996 = vmatpush3.msra.mxu1 %v614_v41 }
  0x95   : > { %962 = vmatprep.subr.mxu0 %v597_v42  ;;  %997 = vmatprep.subr.mxu1 %v629_v43 }
  0x96   : > { %963 = vmatpush3.msra.mxu0 %v581_v44  ;;  %998 = vmatpush3.msra.mxu1 %v613_v45 }
  0x97   : > { %964 = vmatprep.subr.mxu0 %v596_v46  ;;  %999 = vmatprep.subr.mxu1 %v628_v47  ;;  %v937_v47 = vld [vmem:[%s1554_s4] ss:$0 sm:$0xff] }
  0x98   : > { %965 = vmatpush3.msra.mxu0 %v580_v48  ;;  %1000 = vmatpush3.msra.mxu1 %v612_v49 }
  0x99   : > { %966 = vmatprep.subr.mxu0 %v595_v50  ;;  %1001 = vmatprep.subr.mxu1 %v627_v51 }
  0x9a   : > { %967 = vmatpush3.msra.mxu0 %v579_v52  ;;  %1002 = vmatpush3.msra.mxu1 %v611_v53 }
  0x9b   : > { %968 = vmatprep.subr.mxu0 %v594_v54  ;;  %1003 = vmatprep.subr.mxu1 %v626_v55 }
  0x9c   : > { %969 = vmatpush3.msra.mxu0 %v578_v56  ;;  %1004 = vmatpush3.msra.mxu1 %v610_v57 }
  0x9d   : > { %970 = vmatprep.subr.mxu0 %v593_v58  ;;  %1005 = vmatprep.subr.mxu1 %v625_v59 }
  0x9e   : > { %971 = vmatpush3.msra.mxu0 %v577_v60  ;;  %1006 = vmatpush3.msra.mxu1 %v609_v61 }
  0x9f   : > { %972 = vmatprep.subr.mxu0 %v592_v62  ;;  %1007 = vmatprep.subr.mxu1 %v624_v63 }
  0xa0   : > { %973 = vmatpush3.msra.mxu0 %v576_v0  ;;  %1008 = vmatpush3.msra.mxu1 %v608_v1 }
 0x140   : > { %v479_v11 = vpop.f32.mrf.mxu0  ;;  %v550_v12 = vpop.f32.mrf.mxu1 }
 0x141   : > { %v480_v15 = vadd.f32 %v479_v11, %v396_v9  ;;  %v551_v16 = vadd.f32 %v550_v12, %v404_v10 }
 0x142   : > { %v481_v17 = vpop.f32.mrf.mxu0  ;;  %v552_v18 = vpop.f32.mrf.mxu1 }
 0x143   : > { %v559_v19 = vmul.f32 0.70710677, %v480_v15  ;;  %v561_v20 = vmul.f32 0.70710677, %v551_v16  ;;  %v482_v21 = vadd.f32 %v481_v17, %v400_v13  ;;  %v553_v22 = vadd.f32 %v552_v18, %v408_v14 }
 0x144   : > { %v555_v33 = vmul.f32 0.5, %v480_v15  ;;  %v557_v36 = vmul.f32 0.5, %v551_v16 }
 0x145   : > { %1110 = verf.f32 %v559_v19  ;;  %v560_v23 = vmul.f32 0.70710677, %v482_v21  ;;  %v562_v24 = vmul.f32 0.70710677, %v553_v22  ;;  %v556_v31 = vmul.f32 0.5, %v482_v21 }
 0x146   : > { %1112 = verf.f32 %v561_v20  ;;  %v558_v34 = vmul.f32 0.5, %v553_v22 }
 0x147   : > { %1114 = verf.f32 %v560_v23 }
 0x148   : > { %1116 = verf.f32 %v562_v24 }
 0x152   : > { %v1111_v25 = vpop.eup %1110 }
 0x153   : > { %v1113_v26 = vpop.eup %1112  ;;  %v567_v28 = vadd.f32 1.0, %v1111_v25 }
 0x154   : > { %v1115_v27 = vpop.eup %1114  ;;  %v569_v30 = vadd.f32 1.0, %v1113_v26 }
 0x155   : > { %v1117_v29 = vpop.eup %1116  ;;  %v568_v32 = vadd.f32 1.0, %v1115_v27  ;;  %v571_v38 = vmul.f32 %v567_v28, %v555_v33 }
 0x156   : > { %v570_v35 = vadd.f32 1.0, %v1117_v29  ;;  %v573_v40 = vmul.f32 %v569_v30, %v557_v36 }
 0x157   : > { %v572_v37 = vmul.f32 %v568_v32, %v556_v31 }
 0x158   : > { %v574_v39 = vmul.f32 %v570_v35, %v558_v34 }
 0x159   : > { %704 = vmatprep.mubr.f32.mxu0 %v572_v37 }
 0x15a   : > { %774 = vmatprep.mubr.f32.mxu1 %v574_v39  ;;  %705 = vmatmul.mubr.f32.vlgmr.msra.gmra.mxu0 %v571_v38 }
 0x15b   : > { %775 = vmatmul.mubr.f32.vlgmr.msra.gmra.mxu1 %v573_v40 }
 0x21a   : > { %v974_v41 = vpop.f32.mrf.mxu0 }
 0x21b   : > { %v1009_v42 = vpop.f32.mrf.mxu1 }
 0x21c   : > { %v975_v43 = vpop.f32.mrf.mxu0 }
 0x21d   : > { %v976_v44 = vadd.f32 %v975_v43, %v974_v41  ;;  %v1010_v45 = vpop.f32.mrf.mxu1 }
 0x21e   : > { %v1011_v46 = vadd.f32 %v1010_v45, %v1009_v42 }
 0x220   : > { %v777_v48 = vadd.f32 %v1011_v46, %v976_v44 }
 0x222   : > { %v793_v49 = vadd.f32 %v937_v47, %v777_v48 }
 0x224   : > { %794 = vst [vmem:[%s317_s7] sm:$0xff] %v793_v49 }
 0x225   : > { %1237 = shalt.err (!%p1234_p13)
}
 0x226   : > { %s1238_s12 = scalar_lea.hbm %s807_s11, 128  ;;  %s1242_s1 = scalar_lea.hbm %s1555_s5, 256 }
 0x227   : > { %p1239_p1 = scmp.ne.s32.totalorder %s807_s11, %s1238_s12  ;;  %p1243_p12 = scmp.lt.s32.totalorder %s807_s11, %s1555_s5 }
 0x228   : > { %p1244_p5 = scmp.lt.s32.totalorder %s1242_s1, %s1238_s12 }
 0x229   : > { %p1240_p4 = pnand %p1239_p1, %p1454_p0 }
 0x22a   : > { %p1245_p3 = por %p1244_p5, %p1243_p12 }
 0x22b   : > { %p1241_p8 = pneg %p1240_p4 }
 0x22d   : > { %p1246_p10 = pnand %p1245_p3, %p1241_p8 }
 0x22f   : > { %1249 = shalt.err (!%p1246_p10)
}
 0x230   : > { %1026 = dma.vmem_to_hbm [thread:$0]  (%p1454_p0), %s810_s27, 128, %s807_s11, %s796_s13  }
 0x231 PF: > { %s821_s30 = sand.u32 1, %s1292_s18   ;;  %p1573_p2 = scmp.ne.s32.totalorder %s1564_s29, 0 }
 0x232   : > { %p1574_p11 = scmp.ge.s32.totalorder %s1312_s23, 2  ;;  %s822_s7 = scalar_lea.sflag [#allocation5], %s821_s30 }
 0x234   : > { %p1043_p7 = pnand %p1574_p11, %p1573_p2 }
 0x236   : > { %p1044_p6 = pneg %p1043_p7 }
 0x238   : > { %1287 = dma.done.wait (%p1044_p6), %s822_s7, 128  }
 0x239   : > { %1289 = vsyncadd (%p1044_p6), %s822_s7, 4294967168  ;;  %s23_s23 = sadd.s32 1, %s1312_s23   ;;  %s1575_s18 = smov %s1296_s19 }
 0x23a   : > { %p20_p9 = scmp.ge.s32.totalorder %s23_s23, 4   ;;  %s1576_s19 = smov %s1300_s20 }
 0x23b   : > { %s1577_s20 = smov %s1466_s25  ;;  %s1578_s21 = smov %s1308_s22 }
 0x23c   : > { %s1579_s22 = smov %s1581_s15  ;;  %22 = sbr.rel (!%p20_p9) target bundleno = 10 (0xa), region = 108 }
 0x241   :  { %827 = vsyncpa [#allocation4], 1 }
 0x242   :  { %829 = vsyncpa [#allocation4 + $0x1], 1 }
 0x243   :  { %830 = vsyncpa [#allocation7], 1 }
 0x244   :  { %831 = vsyncpa [#allocation10], 1 }
 0x245   :  { %832 = vsyncpa [#allocation5], 1 }
 0x246   :  { %834 = vsyncpa [#allocation5 + $0x1], 1 }

</bundles_post_ra>
